<compile_context>
chip_gen: v7x
topology: tpu7x:2x2x1
jax: 0.10.0
libtpu: 0.0.40
codegen_flags: <defaults>
</compile_context>

<pallas_src>
import jax
import jax.numpy as jnp
from jax.experimental import pallas as pl
from jax.experimental.pallas import tpu as pltpu

_LANE = 512  # lane-dense last dimension (multiple of 128)


def _bmf_kernel(em_ref, i0_ref, k_ref, b_ref, q_ref, vpd_ref, fg_ref, o_ref):
    # em_ref/i0_ref/k_ref/b_ref: scalar-prefetched (SMEM) vectors, shape (num_FGs,)
    # q_ref/vpd_ref (f32) and fg_ref (int32): blocked VMEM tiles.
    q = q_ref[...]
    vpd = vpd_ref[...]
    fg = fg_ref[...]

    num_fgs = em_ref.shape[0]

    # In-kernel functional-group gather via a short select chain (unrolled at
    # trace time; num_FGs is small and the VPU is far from the bottleneck).
    em = em_ref[0]
    i0 = i0_ref[0]
    k = k_ref[0]
    b = b_ref[0]
    for g in range(1, num_fgs):
        sel = fg == g
        em = jnp.where(sel, em_ref[g], em)
        i0 = jnp.where(sel, i0_ref[g], i0)
        k = jnp.where(sel, k_ref[g], k)
        b = jnp.where(sel, b_ref[g], b)

    q_plus_i0 = q + i0
    denom = k + b * q + q_plus_i0 * vpd
    o_ref[...] = em * q_plus_i0 / denom


def bmf_forward(Q, VPD, FGs, Em, i0, k, b, *, tile_rows=512, lane=_LANE):
    """Pallas implementation of BMF.forward().

    Q, VPD : float arrays of shape (N,)
    FGs    : int array of shape (N,) indexing into the per-FG parameters
    Em, i0, k, b : float arrays of shape (num_FGs,)
    Returns gs of shape (N,), float32.
    """
    N = Q.shape[0]
    rows = max(pl.cdiv(N, lane), 1)   # pad only up to a lane multiple
    Np = rows * lane
    pad = Np - N

    def prep(x, dtype):
        x = x.astype(dtype)
        if pad:
            # Padded lanes compute garbage-but-finite values (denom = k[0]);
            # they are sliced off below and never observed.
            x = jnp.pad(x, (0, pad))
        return x.reshape(rows, lane)

    Qp = prep(Q, jnp.float32)
    VPDp = prep(VPD, jnp.float32)
    FGp = prep(FGs, jnp.int32)

    if rows <= tile_rows:
        # Single block covering the whole array (block_shape == array shape,
        # so any row count is legal).
        block_rows = rows
        grid = (1,)
    else:
        block_rows = max(tile_rows - (tile_rows % 8), 8)  # sublane multiple of 8
        grid = (pl.cdiv(rows, block_rows),)               # last block masked by Pallas

    # index_map also receives the 4 scalar-prefetch refs (unused here).
    spec = pl.BlockSpec((block_rows, lane), lambda i, *_: (i, 0))

    # 4 streams (Q, VPD, FGs, out), double-buffered tiles, plus headroom.
    tile_bytes = block_rows * lane * 4
    vmem_need = 4 * 2 * tile_bytes
    vmem_limit = int(min(32 * 1024 * 1024, max(2 * vmem_need, 8 * 1024 * 1024)))

    gs2d = pl.pallas_call(
        _bmf_kernel,
        out_shape=jax.ShapeDtypeStruct((rows, lane), jnp.float32),
        grid_spec=pltpu.PrefetchScalarGridSpec(
            num_scalar_prefetch=4,
            grid=grid,
            in_specs=[spec, spec, spec],
            out_specs=spec,
        ),
        compiler_params=pltpu.CompilerParams(
            dimension_semantics=("parallel",),
            vmem_limit_bytes=vmem_limit,
        ),
    )(
        Em.astype(jnp.float32),
        i0.astype(jnp.float32),
        k.astype(jnp.float32),
        b.astype(jnp.float32),
        Qp,
        VPDp,
        FGp,
    )

    gs = gs2d.reshape(Np)
    return gs[:N] if pad else gs


def _reference(Q, VPD, FGs, Em, i0, k, b):
    Em_g, i0_g, k_g, b_g = Em[FGs], i0[FGs], k[FGs], b[FGs]
    return Em_g * (Q + i0_g) / (k_g + b_g * Q + (Q + i0_g) * VPD)


def _make_params(num_fgs):
    # Deterministic parameter init, matching BMF.__init__:
    return (jnp.ones((num_fgs,), jnp.float32),
            jnp.ones((num_fgs,), jnp.float32) * 10.0,
            jnp.ones((num_fgs,), jnp.float32) * 10000.0,
            jnp.ones((num_fgs,), jnp.float32) * 10.0)


if __name__ == "__main__":
    key = jax.random.PRNGKey(0)
    keys = jax.random.split(key, 9)

    # --- test 1: small, lane-aligned, single-block path ---
    N = 2048
    num_FGs = 4
    Q = jax.random.uniform(keys[0], (N,), jnp.float32, 0.0, 2000.0)   # PAR
    VPD = jax.random.uniform(keys[1], (N,), jnp.float32, 0.1, 3.0)    # kPa
    FGs = jax.random.randint(keys[2], (N,), 0, num_FGs, jnp.int32)
    Em, i0, kk, b = _make_params(num_FGs)

    gs = jax.block_until_ready(bmf_forward(Q, VPD, FGs, Em, i0, kk, b))
    ref = _reference(Q, VPD, FGs, Em, i0, kk, b)
    assert gs.shape == (N,) and gs.dtype == jnp.float32
    assert jnp.allclose(gs, ref, rtol=1e-6, atol=1e-6)

    # --- test 2: non-aligned N with a small tile_rows to exercise the
    # multi-step grid AND the masked partial final block ---
    N2 = 131072 + 53
    num_FGs2 = 3
    Q2 = jax.random.uniform(keys[3], (N2,), jnp.float32, 0.0, 2000.0)
    VPD2 = jax.random.uniform(keys[4], (N2,), jnp.float32, 0.1, 3.0)
    FGs2 = jax.random.randint(keys[5], (N2,), 0, num_FGs2, jnp.int32)
    Em2, i02, kk2, b2 = _make_params(num_FGs2)

    gs2 = jax.block_until_ready(
        bmf_forward(Q2, VPD2, FGs2, Em2, i02, kk2, b2, tile_rows=64)
    )
    ref2 = _reference(Q2, VPD2, FGs2, Em2, i02, kk2, b2)
    assert gs2.shape == (N2,)
    assert jnp.allclose(gs2, ref2, rtol=1e-6, atol=1e-6)

    # --- test 3: default module config (num_FGs == 1), tiny non-aligned N ---
    N3 = 777
    Q3 = jax.random.uniform(keys[6], (N3,), jnp.float32, 0.0, 2000.0)
    VPD3 = jax.random.uniform(keys[7], (N3,), jnp.float32, 0.1, 3.0)
    FGs3 = jnp.zeros((N3,), jnp.int32)
    Em3, i03, kk3, b3 = _make_params(1)

    gs3 = jax.block_until_ready(bmf_forward(Q3, VPD3, FGs3, Em3, i03, kk3, b3))
    ref3 = _reference(Q3, VPD3, FGs3, Em3, i03, kk3, b3)
    assert gs3.shape == (N3,)
    assert jnp.allclose(gs3, ref3, rtol=1e-6, atol=1e-6)

    print("KERNEL_OK")
</pallas_src>

<mosaic_0001>
module attributes {stable_mosaic.version = 11 : i64} {
  func.func @_bmf_kernel(%arg0: i32, %arg1: memref<4xf32, #tpu.memory_space<smem>>, %arg2: memref<4xf32, #tpu.memory_space<smem>>, %arg3: memref<4xf32, #tpu.memory_space<smem>>, %arg4: memref<4xf32, #tpu.memory_space<smem>>, %arg5: memref<4x512xf32, #tpu.memory_space<vmem>>, %arg6: memref<4x512xf32, #tpu.memory_space<vmem>>, %arg7: memref<4x512xi32, #tpu.memory_space<vmem>>, %arg8: memref<4x512xf32, #tpu.memory_space<vmem>>) attributes {dimension_semantics = [#tpu.dimension_semantics<parallel>], iteration_bounds = array<i64: 1>, scalar_prefetch = 4 : i64, scratch_operands = 0 : i64, tpu.core_type = #tpu.core_type<tc>, window_params = [{transform_indices = @transform_0, window_bounds = array<i64: 4, 512>}, {transform_indices = @transform_1, window_bounds = array<i64: 4, 512>}, {transform_indices = @transform_2, window_bounds = array<i64: 4, 512>}, {transform_indices = @transform_3, window_bounds = array<i64: 4, 512>}]} {
    %c0 = arith.constant 0 : index
    %c0_0 = arith.constant 0 : index
    %0 = vector.load %arg5[%c0, %c0_0] : memref<4x512xf32, #tpu.memory_space<vmem>>, vector<4x512xf32>
    %c0_1 = arith.constant 0 : index
    %c0_2 = arith.constant 0 : index
    %1 = vector.load %arg6[%c0_1, %c0_2] : memref<4x512xf32, #tpu.memory_space<vmem>>, vector<4x512xf32>
    %c0_3 = arith.constant 0 : index
    %c0_4 = arith.constant 0 : index
    %2 = vector.load %arg7[%c0_3, %c0_4] : memref<4x512xi32, #tpu.memory_space<vmem>>, vector<4x512xi32>
    %c0_5 = arith.constant 0 : index
    %3 = memref.load %arg1[%c0_5] : memref<4xf32, #tpu.memory_space<smem>>
    %c0_6 = arith.constant 0 : index
    %4 = memref.load %arg2[%c0_6] : memref<4xf32, #tpu.memory_space<smem>>
    %c0_7 = arith.constant 0 : index
    %5 = memref.load %arg3[%c0_7] : memref<4xf32, #tpu.memory_space<smem>>
    %c0_8 = arith.constant 0 : index
    %6 = memref.load %arg4[%c0_8] : memref<4xf32, #tpu.memory_space<smem>>
    %c1_i32 = arith.constant 1 : i32
    %7 = vector.broadcast %c1_i32 : i32 to vector<4x512xi32>
    %8 = arith.cmpi eq, %2, %7 : vector<4x512xi32>
    %c1 = arith.constant 1 : index
    %9 = memref.load %arg1[%c1] : memref<4xf32, #tpu.memory_space<smem>>
    %10 = vector.broadcast %9 : f32 to vector<4x512xf32>
    %11 = vector.broadcast %3 : f32 to vector<4x512xf32>
    %12 = arith.select %8, %10, %11 : vector<4x512xi1>, vector<4x512xf32>
    %c1_9 = arith.constant 1 : index
    %13 = memref.load %arg2[%c1_9] : memref<4xf32, #tpu.memory_space<smem>>
    %14 = vector.broadcast %13 : f32 to vector<4x512xf32>
    %15 = vector.broadcast %4 : f32 to vector<4x512xf32>
    %16 = arith.select %8, %14, %15 : vector<4x512xi1>, vector<4x512xf32>
    %c1_10 = arith.constant 1 : index
    %17 = memref.load %arg3[%c1_10] : memref<4xf32, #tpu.memory_space<smem>>
    %18 = vector.broadcast %17 : f32 to vector<4x512xf32>
    %19 = vector.broadcast %5 : f32 to vector<4x512xf32>
    %20 = arith.select %8, %18, %19 : vector<4x512xi1>, vector<4x512xf32>
    %c1_11 = arith.constant 1 : index
    %21 = memref.load %arg4[%c1_11] : memref<4xf32, #tpu.memory_space<smem>>
    %22 = vector.broadcast %21 : f32 to vector<4x512xf32>
    %23 = vector.broadcast %6 : f32 to vector<4x512xf32>
    %24 = arith.select %8, %22, %23 : vector<4x512xi1>, vector<4x512xf32>
    %c2_i32 = arith.constant 2 : i32
    %25 = vector.broadcast %c2_i32 : i32 to vector<4x512xi32>
    %26 = arith.cmpi eq, %2, %25 : vector<4x512xi32>
    %c2 = arith.constant 2 : index
    %27 = memref.load %arg1[%c2] : memref<4xf32, #tpu.memory_space<smem>>
    %28 = vector.broadcast %27 : f32 to vector<4x512xf32>
    %29 = arith.select %26, %28, %12 : vector<4x512xi1>, vector<4x512xf32>
    %c2_12 = arith.constant 2 : index
    %30 = memref.load %arg2[%c2_12] : memref<4xf32, #tpu.memory_space<smem>>
    %31 = vector.broadcast %30 : f32 to vector<4x512xf32>
    %32 = arith.select %26, %31, %16 : vector<4x512xi1>, vector<4x512xf32>
    %c2_13 = arith.constant 2 : index
    %33 = memref.load %arg3[%c2_13] : memref<4xf32, #tpu.memory_space<smem>>
    %34 = vector.broadcast %33 : f32 to vector<4x512xf32>
    %35 = arith.select %26, %34, %20 : vector<4x512xi1>, vector<4x512xf32>
    %c2_14 = arith.constant 2 : index
    %36 = memref.load %arg4[%c2_14] : memref<4xf32, #tpu.memory_space<smem>>
    %37 = vector.broadcast %36 : f32 to vector<4x512xf32>
    %38 = arith.select %26, %37, %24 : vector<4x512xi1>, vector<4x512xf32>
    %c3_i32 = arith.constant 3 : i32
    %39 = vector.broadcast %c3_i32 : i32 to vector<4x512xi32>
    %40 = arith.cmpi eq, %2, %39 : vector<4x512xi32>
    %c3 = arith.constant 3 : index
    %41 = memref.load %arg1[%c3] : memref<4xf32, #tpu.memory_space<smem>>
    %42 = vector.broadcast %41 : f32 to vector<4x512xf32>
    %43 = arith.select %40, %42, %29 : vector<4x512xi1>, vector<4x512xf32>
    %c3_15 = arith.constant 3 : index
    %44 = memref.load %arg2[%c3_15] : memref<4xf32, #tpu.memory_space<smem>>
    %45 = vector.broadcast %44 : f32 to vector<4x512xf32>
    %46 = arith.select %40, %45, %32 : vector<4x512xi1>, vector<4x512xf32>
    %c3_16 = arith.constant 3 : index
    %47 = memref.load %arg3[%c3_16] : memref<4xf32, #tpu.memory_space<smem>>
    %48 = vector.broadcast %47 : f32 to vector<4x512xf32>
    %49 = arith.select %40, %48, %35 : vector<4x512xi1>, vector<4x512xf32>
    %c3_17 = arith.constant 3 : index
    %50 = memref.load %arg4[%c3_17] : memref<4xf32, #tpu.memory_space<smem>>
    %51 = vector.broadcast %50 : f32 to vector<4x512xf32>
    %52 = arith.select %40, %51, %38 : vector<4x512xi1>, vector<4x512xf32>
    %53 = arith.addf %0, %46 : vector<4x512xf32>
    %54 = arith.mulf %52, %0 : vector<4x512xf32>
    %55 = arith.addf %49, %54 : vector<4x512xf32>
    %56 = arith.mulf %53, %1 : vector<4x512xf32>
    %57 = arith.addf %55, %56 : vector<4x512xf32>
    %58 = arith.mulf %43, %53 : vector<4x512xf32>
    %59 = arith.divf %58, %57 : vector<4x512xf32>
    %c0_18 = arith.constant 0 : index
    %c0_19 = arith.constant 0 : index
    %60 = vector.load %arg8[%c0_18, %c0_19] : memref<4x512xf32, #tpu.memory_space<vmem>>, vector<4x512xf32>
    tpu.vector_store %arg8[%c0_18, %c0_19], %59 {strides = array<i32>} : memref<4x512xf32, #tpu.memory_space<vmem>>, vector<4x512xf32>,
    return
  }
  func.func @transform_0(%arg0: i32, %arg1: memref<4xf32, #tpu.memory_space<smem>>, %arg2: memref<4xf32, #tpu.memory_space<smem>>, %arg3: memref<4xf32, #tpu.memory_space<smem>>, %arg4: memref<4xf32, #tpu.memory_space<smem>>) -> (i32, i32) {
    %c0_i32 = arith.constant 0 : i32
    %c0_i32_0 = arith.constant 0 : i32
    return %arg0, %c0_i32 : i32, i32
  }
  func.func @transform_1(%arg0: i32, %arg1: memref<4xf32, #tpu.memory_space<smem>>, %arg2: memref<4xf32, #tpu.memory_space<smem>>, %arg3: memref<4xf32, #tpu.memory_space<smem>>, %arg4: memref<4xf32, #tpu.memory_space<smem>>) -> (i32, i32) {
    %c0_i32 = arith.constant 0 : i32
    %c0_i32_0 = arith.constant 0 : i32
    return %arg0, %c0_i32 : i32, i32
  }
  func.func @transform_2(%arg0: i32, %arg1: memref<4xf32, #tpu.memory_space<smem>>, %arg2: memref<4xf32, #tpu.memory_space<smem>>, %arg3: memref<4xf32, #tpu.memory_space<smem>>, %arg4: memref<4xf32, #tpu.memory_space<smem>>) -> (i32, i32) {
    %c0_i32 = arith.constant 0 : i32
    %c0_i32_0 = arith.constant 0 : i32
    return %arg0, %c0_i32 : i32, i32
  }
  func.func @transform_3(%arg0: i32, %arg1: memref<4xf32, #tpu.memory_space<smem>>, %arg2: memref<4xf32, #tpu.memory_space<smem>>, %arg3: memref<4xf32, #tpu.memory_space<smem>>, %arg4: memref<4xf32, #tpu.memory_space<smem>>) -> (i32, i32) {
    %c0_i32 = arith.constant 0 : i32
    %c0_i32_0 = arith.constant 0 : i32
    return %arg0, %c0_i32 : i32, i32
  }
}

</mosaic_0001>

<bundles_post_ra>
// kernel: tpu_custom_call.1
= control target key start
LH: loop header
LB: loop body
LE: loop exit
PB: predicated region body
PF: predicated region fallthrough
CT: control target
= control target key end

     0   :  { %s508_s0 = inlined_call_operand.hbm [shape: f32[4], index: 0, kind: input, shape index: {}]   ;;  %s509_s4 = inlined_call_operand.hbm [shape: f32[4,512], index: 4, kind: input, shape index: {}]   ;;  %s510_s5 = inlined_call_operand.vmem [shape: f32[4,512], index: 5, kind: input, shape index: {}]   ;;  %s511_s6 = inlined_call_operand.hbm [shape: s32[4,512], index: 6, kind: input, shape index: {}]   ;;  %s512_s7 = inlined_call_operand.hbm [shape: f32[4,512], index: 7, kind: output, shape index: {}]   ;;  %s513_s1 = inlined_call_operand.vmem [shape: f32[4], index: 1, kind: input, shape index: {}]   ;;  %s514_s2 = inlined_call_operand.vmem [shape: f32[4], index: 2, kind: input, shape index: {}]   ;;  %s515_s3 = inlined_call_operand.hbm [shape: f32[4], index: 3, kind: input, shape index: {}]  }
   0x1   :  { %s182_s26 = scalar_lea.hbm %s508_s0, 16 }
   0x2   :  { %p183_p0 = scmp.ne.s32.totalorder %s508_s0, %s182_s26  ;;  %p186_p1 = scmp.lt.u32.totalorder %s182_s26, %s508_s0 }
   0x4   :  { %p188_p2 = pnand %p186_p1, %p183_p0 }
   0x6   :  { %191 = shalt.err (!%p188_p2)  }
   0x7   :  { %s300_s8 = smov [#allocation3]   ;;  %s14_s13 = sshll.u32 %s513_s1, 4  ;;  %s15_s13 = int_to_ptr.vmem [resolvable:$true] %s14_s13 }
   0x8   :  { %13 = dma.hbm_to_smem %s508_s0, 16, %s300_s8, [#allocation2] }
   0x9   :  { %s18_s16 = sshll.u32 %s514_s2, 4  ;;  %s192_s17 = scalar_lea.vmem %s15_s13, 16  ;;  %s19_s16 = int_to_ptr.vmem [resolvable:$true] %s18_s16 }
   0xa   :  { %p193_p3 = scmp.ne.s32.totalorder %s15_s13, %s192_s17  ;;  %p197_p4 = scmp.lt.s32.totalorder %s15_s13, %s15_s13 }
   0xb   :  { %p198_p5 = scmp.lt.s32.totalorder %s192_s17, %s192_s17 }
   0xd   :  { %p199_p6 = por %p198_p5, %p197_p4 }
   0xf   :  { %p200_p7 = pnand %p199_p6, %p193_p3 }
  0x11   :  { %203 = shalt.err (!%p200_p7)  }
  0x12   :  { %s301_s18 = smov [#allocation4]   ;;  %s204_s0 = scalar_lea.vmem %s19_s16, 16 }
  0x13   :  { %17 = dma.vmem_to_smem %s15_s13, 16, %s301_s18, [#allocation2] }
  0x14   :  { %p205_p8 = scmp.ne.s32.totalorder %s19_s16, %s204_s0  ;;  %p209_p9 = scmp.lt.s32.totalorder %s19_s16, %s19_s16 }
  0x15   :  { %p210_p10 = scmp.lt.s32.totalorder %s204_s0, %s204_s0 }
  0x17   :  { %p211_p11 = por %p210_p10, %p209_p9 }
  0x19   :  { %p212_p12 = pnand %p211_p11, %p205_p8 }
  0x1b   :  { %215 = shalt.err (!%p212_p12)  }
  0x1c   :  { %s302_s1 = smov [#allocation5]   ;;  %s216_s20 = scalar_lea.hbm %s515_s3, 16 }
  0x1d   :  { %21 = dma.vmem_to_smem %s19_s16, 16, %s302_s1, [#allocation2] }
  0x1e   :  { %p217_p13 = scmp.ne.s32.totalorder %s515_s3, %s216_s20  ;;  %p220_p0 = scmp.lt.u32.totalorder %s216_s20, %s515_s3 }
  0x20   :  { %p222_p1 = pnand %p220_p0, %p217_p13 }
  0x22   :  { %225 = shalt.err (!%p222_p1)  }
  0x23   :  { %s303_s25 = smov [#allocation6]  }
  0x24   :  { %23 = dma.hbm_to_smem %s515_s3, 16, %s303_s25, [#allocation2] }
  0x25   :  { %292 = dma.done.wait [#allocation2], 64 }
  0x26   :  { %293 = vsyncadd [#allocation2], 4294967232 }
  0x27   :  { %25 = sfence }
  0x28   :  { %26 = vsyncpa [#allocation8], 0 }
  0x29   :  { %27 = vsyncpa [#allocation11], 0 }
  0x2a   :  { %28 = vsyncpa [#allocation9], 0  ;;  %s304_s28 = smov [#allocation7]   ;;  %s305_s30 = smov [#allocation10]  }
  0x2b   :  { %s35_s29 = sshll.u32 %s304_s28, 4  ;;  %s47_s8 = sshll.u32 %s305_s30, 4  ;;  %s36_s29 = int_to_ptr.vmem [resolvable:$true] %s35_s29  ;;  %s48_s8 = int_to_ptr.vmem [resolvable:$true] %s47_s8 }
  0x2c   :  { %s226_s11 = scalar_lea.hbm %s509_s4, 256 }
  0x2d   :  { %p227_p2 = scmp.ne.s32.totalorder %s509_s4, %s226_s11  ;;  %p230_p3 = scmp.lt.u32.totalorder %s226_s11, %s509_s4 }
  0x2f   :  { %p232_p4 = pnand %p230_p3, %p227_p2 }
  0x31   :  { %235 = shalt.err (!%p232_p4)
}
  0x32   :  { %s236_s15 = scalar_lea.vmem %s36_s29, 256  ;;  %p241_p6 = scmp.lt.s32.totalorder %s36_s29, %s36_s29 }
  0x33   :  { %p237_p5 = scmp.ne.s32.totalorder %s36_s29, %s236_s15  ;;  %p242_p7 = scmp.lt.s32.totalorder %s236_s15, %s236_s15 }
  0x35   :  { %p243_p8 = por %p242_p7, %p241_p6 }
  0x37   :  { %p244_p9 = pnand %p243_p8, %p237_p5 }
  0x39   :  { %247 = shalt.err (!%p244_p9)
}
  0x3a   :  { %38 = dma.hbm_to_vmem [thread:$0]  %s509_s4, 256, %s36_s29, [#allocation8]  }
  0x3b   :  { %s248_s1 = scalar_lea.hbm %s511_s6, 256 }
  0x3c   :  { %p249_p10 = scmp.ne.s32.totalorder %s511_s6, %s248_s1  ;;  %p252_p11 = scmp.lt.u32.totalorder %s248_s1, %s511_s6 }
  0x3e   :  { %p254_p12 = pnand %p252_p11, %p249_p10 }
  0x40   :  { %257 = shalt.err (!%p254_p12)
}
  0x41   :  { %s258_s22 = scalar_lea.vmem %s48_s8, 256  ;;  %p263_p0 = scmp.lt.s32.totalorder %s48_s8, %s48_s8 }
  0x42   :  { %p259_p13 = scmp.ne.s32.totalorder %s48_s8, %s258_s22  ;;  %p264_p1 = scmp.lt.s32.totalorder %s258_s22, %s258_s22 }
  0x44   :  { %p265_p2 = por %p264_p1, %p263_p0 }
  0x46   :  { %p266_p3 = pnand %p265_p2, %p259_p13 }
  0x48   :  { %269 = shalt.err (!%p266_p3)
}
  0x49   :  { %50 = dma.hbm_to_vmem [thread:$0]  %s511_s6, 256, %s48_s8, [#allocation11]  }
  0x4a   :  { %294 = dma.done.wait [#allocation8], 256  }
  0x4b   :  { %295 = vsyncadd [#allocation8], 4294967040 }
  0x4c   :  { %296 = dma.done.wait [#allocation11], 256  }
  0x4d   :  { %297 = vsyncadd [#allocation11], 4294967040  ;;  %s401_s24 = sld [smem:[#allocation4]]  ;;  %s407_s27 = sld [smem:[#allocation4 + $0x1]]  ;;  %v421_v0 = vld [vmem:[#allocation10] sm:$0xff]  ;;  %v62_v8 = vld [vmem:[#allocation10 + $0x8] sm:$0xff] }
  0x4e   :  { %s403_s25 = sld [smem:[#allocation5]]  ;;  %s409_s28 = sld [smem:[#allocation5 + $0x1]]  ;;  %vm67_vm0 = vcmp.eq.s32.totalorder %v421_v0, 1  ;;  %vm89_vm1 = vcmp.eq.s32.totalorder %v421_v0, 2  ;;  %vm107_vm2 = vcmp.eq.s32.totalorder %v421_v0, 3  ;;  %v57_v15 = vld [vmem:[#allocation7] sm:$0xff] }
  0x4f   :  { %s405_s26 = sld [smem:[#allocation6]]  ;;  %s411_s29 = sld [smem:[#allocation6 + $0x1]]  ;;  %vm68_vm3 = vcmp.eq.s32.totalorder %v62_v8, 1  ;;  %v59_v21 = vld [vmem:[%s510_s5] sm:$0xff]  ;;  %vm90_vm4 = vcmp.eq.s32.totalorder %v62_v8, 2  ;;  %vm108_vm5 = vcmp.eq.s32.totalorder %v62_v8, 3 }
  0x50   :  { %s413_s6 = sld [smem:[#allocation3]]  ;;  %s415_s30 = sld [smem:[#allocation4 + $0x2]]  ;;  %v58_v33 = vld [vmem:[#allocation7 + $0x8] sm:$0xff]  ;;  %v60_v39 = vld [vmem:[%s510_s5 + $0x8] sm:$0xff] }
  0x51   :  { %s417_s8 = sld [smem:[#allocation5 + $0x2]]  ;;  %s427_s10 = sld [smem:[#allocation4 + $0x3]] }
  0x52   :  { %s419_s9 = sld [smem:[#allocation6 + $0x2]]  ;;  %s429_s11 = sld [smem:[#allocation5 + $0x3]] }
  0x53   :  { %v76_v1 = vstv %s401_s24  ;;  %s431_s12 = sld [smem:[#allocation3 + $0x1]]  ;;  %v75_v4 = vstv %s407_s27  ;;  %s435_s13 = sld [smem:[#allocation6 + $0x3]] }
  0x54   :  { %v81_v2 = vstv %s403_s25  ;;  %v77_v5 = vsel %vm67_vm0, %v75_v4, %v76_v1  ;;  %v80_v6 = vstv %s409_s28  ;;  %s451_s3 = sld [smem:[#allocation3 + $0x2]]  ;;  %v78_v25 = vsel %vm68_vm3, %v75_v4, %v76_v1  ;;  %s469_s16 = sld [smem:[#allocation3 + $0x3]] }
  0x55   :  { %v86_v3 = vstv %s405_s26  ;;  %v85_v7 = vstv %s411_s29  ;;  %v82_v9 = vsel %vm67_vm0, %v80_v6, %v81_v2  ;;  %v83_v28 = vsel %vm68_vm3, %v80_v6, %v81_v2  ;;  %s306_s5 = smov [#allocation12]  }
  0x56   :  { %v87_v10 = vsel %vm67_vm0, %v85_v7, %v86_v3  ;;  %v96_v11 = vstv %s415_s30  ;;  %v71_v18 = vstv %s413_s6  ;;  %v88_v29 = vsel %vm68_vm3, %v85_v7, %v86_v3  ;;  %s149_s0 = sshll.u32 %s306_s5, 4  ;;  %s150_s0 = int_to_ptr.vmem [resolvable:$true] %s149_s0 }
  0x57   :  { %v97_v12 = vsel %vm89_vm1, %v96_v11, %v77_v5  ;;  %v100_v13 = vstv %s417_s8  ;;  %v114_v19 = vstv %s427_s10  ;;  %v98_v34 = vsel %vm90_vm4, %v96_v11, %v78_v25  ;;  %s270_s1 = scalar_lea.vmem %s150_s0, 256  ;;  %p275_p5 = scmp.lt.s32.totalorder %s150_s0, %s150_s0 }
  0x58   :  { %v104_v14 = vstv %s419_s9  ;;  %v101_v16 = vsel %vm89_vm1, %v100_v13, %v82_v9  ;;  %v118_v20 = vstv %s429_s11  ;;  %v115_v22 = vsel %vm107_vm2, %v114_v19, %v97_v12  ;;  %p271_p4 = scmp.ne.s32.totalorder %s150_s0, %s270_s1  ;;  %p276_p6 = scmp.lt.s32.totalorder %s270_s1, %s270_s1 }
  0x59   :  { %v105_v17 = vsel %vm89_vm1, %v104_v14, %v87_v10  ;;  %v119_v23 = vsel %vm107_vm2, %v118_v20, %v101_v16  ;;  %v122_v24 = vstv %s435_s13  ;;  %v125_v27 = vadd.f32 %v115_v22, %v57_v15 }
  0x5a   :  { %v123_v26 = vsel %vm107_vm2, %v122_v24, %v105_v17  ;;  %v70_v30 = vstv %s431_s12  ;;  %v102_v36 = vsel %vm90_vm4, %v100_v13, %v83_v28  ;;  %v106_v37 = vsel %vm90_vm4, %v104_v14, %v88_v29  ;;  %p277_p7 = por %p276_p6, %p275_p5 }
  0x5b   :  { %v127_v31 = vmul.f32 %v123_v26, %v57_v15  ;;  %v131_v32 = vmul.f32 %v125_v27, %v59_v21  ;;  %v72_v38 = vsel %vm67_vm0, %v70_v30, %v71_v18  ;;  %v116_v40 = vsel %vm108_vm5, %v114_v19, %v98_v34 }
  0x5c   :  { %v120_v41 = vsel %vm108_vm5, %v118_v20, %v102_v36  ;;  %v124_v42 = vsel %vm108_vm5, %v122_v24, %v106_v37  ;;  %v92_v43 = vstv %s451_s3  ;;  %v126_v45 = vadd.f32 %v116_v40, %v58_v33  ;;  %p278_p8 = pnand %p277_p7, %p271_p4 }
  0x5d   :  { %v129_v35 = vadd.f32 %v127_v31, %v119_v23  ;;  %v128_v46 = vmul.f32 %v124_v42, %v58_v33  ;;  %v93_v49 = vsel %vm89_vm1, %v92_v43, %v72_v38  ;;  %v110_v50 = vstv %s469_s16 }
  0x5e   :  { %v132_v48 = vmul.f32 %v126_v45, %v60_v39  ;;  %v73_v51 = vsel %vm68_vm3, %v70_v30, %v71_v18  ;;  %v111_v53 = vsel %vm107_vm2, %v110_v50, %v93_v49 }
  0x5f   :  { %v133_v44 = vadd.f32 %v131_v32, %v129_v35  ;;  %v130_v47 = vadd.f32 %v128_v46, %v120_v41  ;;  %v94_v54 = vsel %vm90_vm4, %v92_v43, %v73_v51  ;;  %v135_v55 = vmul.f32 %v125_v27, %v111_v53 }
  0x60   :  { %v112_v56 = vsel %vm108_vm5, %v110_v50, %v94_v54 }
  0x61   :  { %178 = vrcp.f32 %v133_v44  ;;  %v134_v52 = vadd.f32 %v132_v48, %v130_v47  ;;  %v136_v59 = vmul.f32 %v126_v45, %v112_v56 }
  0x63   :  { %180 = vrcp.f32 %v134_v52 }
  0x6b   :  { %v179_v57 = vpop.eup %178 }
  0x6c   :  { %v138_v58 = vmul.f32 %v179_v57, %v135_v55 }
  0x6d   :  { %v181_v60 = vpop.eup %180 }
  0x6e   :  { %141 = vst [vmem:[#allocation12] sm:$0xff] %v138_v58  ;;  %v140_v61 = vmul.f32 %v181_v60, %v136_v59 }
  0x70   :  { %142 = vst [vmem:[#allocation12 + $0x8] sm:$0xff] %v140_v61 }
  0x71   :  { %281 = shalt.err (!%p278_p8)
}
  0x72   :  { %s282_s20 = scalar_lea.hbm %s512_s7, 256 }
  0x73   :  { %p283_p9 = scmp.ne.s32.totalorder %s512_s7, %s282_s20  ;;  %p286_p10 = scmp.lt.u32.totalorder %s282_s20, %s512_s7 }
  0x75   :  { %p288_p11 = pnand %p286_p10, %p283_p9 }
  0x77   :  { %291 = shalt.err (!%p288_p11)
}
  0x78   :  { %152 = dma.vmem_to_hbm [thread:$0]  %s150_s0, 256, %s512_s7, [#allocation9]  }
  0x79   :  { %298 = dma.done.wait [#allocation9], 256  }
  0x7a   :  { %299 = vsyncadd [#allocation9], 4294967040 }
  0x7b   :  { %156 = vsyncpa [#allocation8], 1 }
  0x7c   :  { %157 = vsyncpa [#allocation11], 1 }
  0x7d   :  { %158 = vsyncpa [#allocation9], 1 }

</bundles_post_ra>
